<compile_context>
chip_gen: v5e
topology: v5e:2x2
jax: 0.10.0
libtpu: 0.0.40
codegen_flags: <defaults>
</compile_context>

<pallas_src>
import jax
import jax.numpy as jnp
from jax.experimental import pallas as pl
from jax.experimental.pallas import tpu as pltpu

H1 = 400
H2 = 200
LATENT = 40

H1_PAD = 512       # 400 -> lane-dense
H2_PAD = 256       # 200 -> lane-dense
LATENT_PAD = 128   # fused mu|logvar slab, one full lane width

MAX_TILE_B = 1024  # batch-tile cap (few MiB of VMEM at these widths)


def _round_up(x, m):
    return (x + m - 1) // m * m


def vae_forward_kernel(
    x_ref,
    w1_ref, b1_ref,
    w2_ref, b2_ref,
    wmv_ref, bmv_ref,
    w3_ref, b3_ref,
    w4_ref, b4_ref,
    recon_ref, mulv_ref,
):
    # x may arrive as f32 (un-padded fast path) or bf16 (padded path); the cast
    # is a no-op in the latter case.
    x = x_ref[...].astype(jnp.bfloat16)

    # ---- encoder ----
    h1 = jnp.maximum(
        jnp.dot(x, w1_ref[...], preferred_element_type=jnp.float32) + b1_ref[...],
        0.0,
    )
    h2 = jnp.maximum(
        jnp.dot(h1.astype(jnp.bfloat16), w2_ref[...],
                preferred_element_type=jnp.float32) + b2_ref[...],
        0.0,
    )

    # Fused fc21|fc22: one [H2_PAD, 128] matmul. Lanes 0:40 = mu,
    # 40:80 = logvar, 80:128 = zero padding.
    mulv = (
        jnp.dot(h2.astype(jnp.bfloat16), wmv_ref[...],
                preferred_element_type=jnp.float32) + bmv_ref[...]
    )

    # ---- decoder (z = mu, matching the PyTorch forward) ----
    # w3 is padded to [128, H1_PAD] with zero rows for the logvar/padding
    # lanes, so feeding the whole fused slab is exactly mu @ w3.
    h3 = jnp.maximum(
        jnp.dot(mulv.astype(jnp.bfloat16), w3_ref[...],
                preferred_element_type=jnp.float32) + b3_ref[...],
        0.0,
    )
    recon = jnp.tanh(
        jnp.dot(h3.astype(jnp.bfloat16), w4_ref[...],
                preferred_element_type=jnp.float32) + b4_ref[...]
    )

    recon_ref[...] = recon
    mulv_ref[...] = mulv


def init_linear(key, in_features, out_features):
    """PyTorch-style uniform(-1/sqrt(in), 1/sqrt(in)) init.

    Returns (W_transposed [in, out], b [1, out]) in float32."""
    kw, kb = jax.random.split(key)
    bound = 1.0 / jnp.sqrt(jnp.float32(in_features))
    w = jax.random.uniform(
        kw, (in_features, out_features), jnp.float32, minval=-bound, maxval=bound
    )
    b = jax.random.uniform(
        kb, (1, out_features), jnp.float32, minval=-bound, maxval=bound
    )
    return w, b


def make_vae_params(input_dim, key):
    keys = jax.random.split(key, 6)
    return {
        "fc1": init_linear(keys[0], input_dim, H1),
        "fc2": init_linear(keys[1], H1, H2),
        "fc21": init_linear(keys[2], H2, LATENT),
        "fc22": init_linear(keys[3], H2, LATENT),
        "fc3": init_linear(keys[4], LATENT, H1),
        "fc4": init_linear(keys[5], H1, input_dim),
    }


def pack_vae_params(params, input_dim):
    """Fuse fc21/fc22, pad feature/hidden dims to lane-dense widths, cast
    matmul weights to bf16 (biases stay f32 for the accumulation path)."""
    d_pad = _round_up(input_dim, 128)

    w1, b1 = params["fc1"]
    w2, b2 = params["fc2"]
    w21, b21 = params["fc21"]
    w22, b22 = params["fc22"]
    w3, b3 = params["fc3"]
    w4, b4 = params["fc4"]

    # fc1: pad input rows (extra x lanes are zero) and output cols (zero bias
    # -> relu(0)=0, inert downstream).
    w1p = (
        jnp.zeros((d_pad, H1_PAD), jnp.float32)
        .at[:input_dim, :H1].set(w1)
        .astype(jnp.bfloat16)
    )
    b1p = jnp.zeros((1, H1_PAD), jnp.float32).at[:, :H1].set(b1[0])

    w2p = (
        jnp.zeros((H1_PAD, H2_PAD), jnp.float32)
        .at[:H1, :H2].set(w2)
        .astype(jnp.bfloat16)
    )
    b2p = jnp.zeros((1, H2_PAD), jnp.float32).at[:, :H2].set(b2[0])

    # Fused fc21|fc22 -> one lane-dense [H2_PAD, 128] weight + bias.
    wmv = (
        jnp.zeros((H2_PAD, LATENT_PAD), jnp.float32)
        .at[:H2, :LATENT].set(w21)
        .at[:H2, LATENT:2 * LATENT].set(w22)
        .astype(jnp.bfloat16)
    )
    bmv = (
        jnp.zeros((1, LATENT_PAD), jnp.float32)
        .at[:, :LATENT].set(b21[0])
        .at[:, LATENT:2 * LATENT].set(b22[0])
    )

    # fc3 consumes the fused slab directly: zero rows for logvar/padding lanes.
    w3p = (
        jnp.zeros((LATENT_PAD, H1_PAD), jnp.float32)
        .at[:LATENT, :H1].set(w3)
        .astype(jnp.bfloat16)
    )
    b3p = jnp.zeros((1, H1_PAD), jnp.float32).at[:, :H1].set(b3[0])

    # fc4: pad output lanes to d_pad with zero weights/bias (padded recon
    # lanes come out as tanh(0) = 0 and are dropped in the wrapper).
    w4p = (
        jnp.zeros((H1_PAD, d_pad), jnp.float32)
        .at[:H1, :input_dim].set(w4)
        .astype(jnp.bfloat16)
    )
    b4p = jnp.zeros((1, d_pad), jnp.float32).at[:, :input_dim].set(b4[0])

    return (w1p, b1p, w2p, b2p, wmv, bmv, w3p, b3p, w4p, b4p)


def _pick_batch_tiling(B):
    """Return (tile_b, b_pad, grid)."""
    b_r8 = _round_up(B, 8)
    if b_r8 <= 16:
        # Trivially small batch: one full tile.
        tile_b = b_r8
    elif b_r8 <= 2 * MAX_TILE_B:
        # Split into exactly 2 tiles so the 'parallel' batch axis can shard
        # across both TensorCores on v7x (negligible cost on v5e/v6e).
        tile_b = _round_up((b_r8 + 1) // 2, 8)
    else:
        tile_b = MAX_TILE_B
    b_pad = _round_up(b_r8, tile_b)
    return tile_b, b_pad, (b_pad // tile_b,)


def vae_forward(x, params):
    """x: [B, input_dim] float32.

    Returns (recon [B, input_dim] f32, mu [B, 40] f32, logvar [B, 40] f32)."""
    B, input_dim = x.shape
    d_pad = _round_up(input_dim, 128)
    tile_b, b_pad, grid = _pick_batch_tiling(B)

    packed = pack_vae_params(params, input_dim)

    need_pad = (b_pad != B) or (d_pad != input_dim)
    if need_pad:
        # Build the padded x directly in bf16 (single wrapper-side pass).
        x_in = (
            jnp.zeros((b_pad, d_pad), jnp.bfloat16)
            .at[:B, :input_dim].set(x.astype(jnp.bfloat16))
        )
    else:
        # Already aligned: no wrapper-side copy at all; kernel casts to bf16.
        x_in = x

    def batch_spec(cols):
        return pl.BlockSpec((tile_b, cols), lambda i: (i, 0))

    def resident_spec(shape):
        # Full-array block, constant index map -> stays VMEM-resident across
        # all grid steps. Total bf16 weight footprint < 1 MiB, so default
        # buffering of these operands is not a VMEM concern.
        return pl.BlockSpec(shape, lambda i: (0, 0))

    in_specs = [batch_spec(d_pad)] + [resident_spec(p.shape) for p in packed]
    out_specs = [batch_spec(d_pad), batch_spec(LATENT_PAD)]
    out_shapes = (
        jax.ShapeDtypeStruct((b_pad, d_pad), jnp.float32),       # recon (padded)
        jax.ShapeDtypeStruct((b_pad, LATENT_PAD), jnp.float32),  # mu|logvar slab
    )

    weight_bytes = sum(int(p.size) * p.dtype.itemsize for p in packed)
    x_bytes = int(x_in.size) * x_in.dtype.itemsize
    flops = 2 * b_pad * (
        d_pad * H1_PAD + H1_PAD * H2_PAD + H2_PAD * LATENT_PAD
        + LATENT_PAD * H1_PAD + H1_PAD * d_pad
    )
    bytes_accessed = x_bytes + 4 * b_pad * (d_pad + LATENT_PAD) + weight_bytes
    cost = pl.CostEstimate(
        flops=flops,
        transcendentals=b_pad * d_pad,  # tanh on the recon slab
        bytes_accessed=bytes_accessed,
    )

    # Raise the scoped VMEM limit only when the tile actually grows past the
    # conservative default (needed on v5e's 16 MiB scoped default for 1K-row
    # tiles); 64 MiB stays within physical VMEM on every generation.
    vmem_limit = 64 * 1024 * 1024 if tile_b > 256 else None

    recon_pad, mulv = pl.pallas_call(
        vae_forward_kernel,
        out_shape=out_shapes,
        grid_spec=pltpu.PrefetchScalarGridSpec(
            num_scalar_prefetch=0,
            grid=grid,
            in_specs=in_specs,
            out_specs=out_specs,
        ),
        compiler_params=pltpu.CompilerParams(
            dimension_semantics=("parallel",),
            vmem_limit_bytes=vmem_limit,
        ),
        cost_estimate=cost,
    )(x_in, *packed)

    recon = recon_pad[:B, :input_dim] if need_pad else recon_pad
    mu = mulv[:B, :LATENT]
    logvar = mulv[:B, LATENT:2 * LATENT]
    return recon, mu, logvar


def _ref_forward(x, p):
    """Pure-JAX f32 reference with identical forward semantics (z = mu)."""
    h1 = jnp.maximum(x @ p["fc1"][0] + p["fc1"][1], 0.0)
    h2 = jnp.maximum(h1 @ p["fc2"][0] + p["fc2"][1], 0.0)
    mu = h2 @ p["fc21"][0] + p["fc21"][1]
    logvar = h2 @ p["fc22"][0] + p["fc22"][1]
    h3 = jnp.maximum(mu @ p["fc3"][0] + p["fc3"][1], 0.0)
    recon = jnp.tanh(h3 @ p["fc4"][0] + p["fc4"][1])
    return recon, mu, logvar


if __name__ == "__main__":
    input_dim = 64
    key = jax.random.PRNGKey(0)
    k_params, k_x1, k_x2 = jax.random.split(key, 3)

    params = make_vae_params(input_dim, k_params)
    fwd = jax.jit(vae_forward)

    # bf16 matmul operands (f32 accumulation) -> relaxed tolerances.
    TOL = dict(atol=3e-2, rtol=3e-2)

    # Small-batch path (single full tile, grid=(1,)).
    x_small = jax.random.normal(k_x1, (8, input_dim), dtype=jnp.float32)
    recon, mu, logvar = fwd(x_small, params)
    jax.block_until_ready((recon, mu, logvar))

    r_ref, mu_ref, lv_ref = _ref_forward(x_small, params)
    assert recon.shape == (8, input_dim) and mu.shape == (8, LATENT)
    assert logvar.shape == (8, LATENT)
    assert jnp.allclose(recon, r_ref, **TOL)
    assert jnp.allclose(mu, mu_ref, **TOL)
    assert jnp.allclose(logvar, lv_ref, **TOL)

    # Gridded path (2 batch tiles -> both v7x TensorCores busy).
    x_big = jax.random.normal(k_x2, (384, input_dim), dtype=jnp.float32)
    recon_b, mu_b, lv_b = fwd(x_big, params)
    jax.block_until_ready((recon_b, mu_b, lv_b))

    r_ref_b, mu_ref_b, lv_ref_b = _ref_forward(x_big, params)
    assert recon_b.shape == (384, input_dim)
    assert jnp.allclose(recon_b, r_ref_b, **TOL)
    assert jnp.allclose(mu_b, mu_ref_b, **TOL)
    assert jnp.allclose(lv_b, lv_ref_b, **TOL)

    print("KERNEL_OK")
</pallas_src>

<mosaic_0001>
module attributes {stable_mosaic.version = 11 : i64} {
  func.func @vae_forward_kernel(%arg0: i32, %arg1: memref<8x128xbf16, #tpu.memory_space<vmem>>, %arg2: memref<128x512xbf16, #tpu.memory_space<vmem>>, %arg3: memref<1x512xf32, #tpu.memory_space<vmem>>, %arg4: memref<512x256xbf16, #tpu.memory_space<vmem>>, %arg5: memref<1x256xf32, #tpu.memory_space<vmem>>, %arg6: memref<256x128xbf16, #tpu.memory_space<vmem>>, %arg7: memref<1x128xf32, #tpu.memory_space<vmem>>, %arg8: memref<128x512xbf16, #tpu.memory_space<vmem>>, %arg9: memref<1x512xf32, #tpu.memory_space<vmem>>, %arg10: memref<512x128xbf16, #tpu.memory_space<vmem>>, %arg11: memref<1x128xf32, #tpu.memory_space<vmem>>, %arg12: memref<8x128xf32, #tpu.memory_space<vmem>>, %arg13: memref<8x128xf32, #tpu.memory_space<vmem>>) attributes {dimension_semantics = [#tpu.dimension_semantics<parallel>], iteration_bounds = array<i64: 1>, scalar_prefetch = 0 : i64, scratch_operands = 0 : i64, tpu.core_type = #tpu.core_type<tc>, window_params = [{transform_indices = @transform_0, window_bounds = array<i64: 8, 128>}, {pipeline_mode = #tpu.pipeline_mode<synchronous>, transform_indices = @transform_1, window_bounds = array<i64: 128, 512>}, {pipeline_mode = #tpu.pipeline_mode<synchronous>, transform_indices = @transform_2, window_bounds = array<i64: 1, 512>}, {pipeline_mode = #tpu.pipeline_mode<synchronous>, transform_indices = @transform_3, window_bounds = array<i64: 512, 256>}, {pipeline_mode = #tpu.pipeline_mode<synchronous>, transform_indices = @transform_4, window_bounds = array<i64: 1, 256>}, {pipeline_mode = #tpu.pipeline_mode<synchronous>, transform_indices = @transform_5, window_bounds = array<i64: 256, 128>}, {pipeline_mode = #tpu.pipeline_mode<synchronous>, transform_indices = @transform_6, window_bounds = array<i64: 1, 128>}, {pipeline_mode = #tpu.pipeline_mode<synchronous>, transform_indices = @transform_7, window_bounds = array<i64: 128, 512>}, {pipeline_mode = #tpu.pipeline_mode<synchronous>, transform_indices = @transform_8, window_bounds = array<i64: 1, 512>}, {pipeline_mode = #tpu.pipeline_mode<synchronous>, transform_indices = @transform_9, window_bounds = array<i64: 512, 128>}, {pipeline_mode = #tpu.pipeline_mode<synchronous>, transform_indices = @transform_10, window_bounds = array<i64: 1, 128>}, {transform_indices = @transform_11, window_bounds = array<i64: 8, 128>}, {transform_indices = @transform_12, window_bounds = array<i64: 8, 128>}]} {
    %c0 = arith.constant 0 : index
    %c0_0 = arith.constant 0 : index
    %0 = vector.load %arg1[%c0, %c0_0] : memref<8x128xbf16, #tpu.memory_space<vmem>>, vector<8x128xbf16>
    %c0_1 = arith.constant 0 : index
    %c0_2 = arith.constant 0 : index
    %1 = vector.load %arg2[%c0_1, %c0_2] : memref<128x512xbf16, #tpu.memory_space<vmem>>, vector<128x512xbf16>
    %cst = arith.constant dense<0.000000e+00> : vector<8x512xf32>
    %2 = tpu.matmul %0, %1, %cst {dimension_numbers = #tpu.dot_dimension_numbers<[1], [0], [0], [1], [0, 0, 1, 1], [], []>} : vector<8x128xbf16>, vector<128x512xbf16>, vector<8x512xf32> -> vector<8x512xf32>
    %c0_3 = arith.constant 0 : index
    %c0_4 = arith.constant 0 : index
    %3 = vector.load %arg3[%c0_3, %c0_4] : memref<1x512xf32, #tpu.memory_space<vmem>>, vector<1x512xf32>
    %4 = vector.broadcast %3 : vector<1x512xf32> to vector<8x512xf32>
    %5 = arith.addf %2, %4 : vector<8x512xf32>
    %cst_5 = arith.constant 0.000000e+00 : f32
    %6 = vector.broadcast %cst_5 : f32 to vector<8x512xf32>
    %7 = arith.maximumf %5, %6 : vector<8x512xf32>
    %8 = arith.truncf %7 : vector<8x512xf32> to vector<8x512xbf16>
    %c0_6 = arith.constant 0 : index
    %c0_7 = arith.constant 0 : index
    %9 = vector.load %arg4[%c0_6, %c0_7] : memref<512x256xbf16, #tpu.memory_space<vmem>>, vector<512x256xbf16>
    %cst_8 = arith.constant dense<0.000000e+00> : vector<8x256xf32>
    %10 = tpu.matmul %8, %9, %cst_8 {dimension_numbers = #tpu.dot_dimension_numbers<[1], [0], [0], [1], [0, 0, 1, 1], [], []>} : vector<8x512xbf16>, vector<512x256xbf16>, vector<8x256xf32> -> vector<8x256xf32>
    %c0_9 = arith.constant 0 : index
    %c0_10 = arith.constant 0 : index
    %11 = vector.load %arg5[%c0_9, %c0_10] : memref<1x256xf32, #tpu.memory_space<vmem>>, vector<1x256xf32>
    %12 = vector.broadcast %11 : vector<1x256xf32> to vector<8x256xf32>
    %13 = arith.addf %10, %12 : vector<8x256xf32>
    %cst_11 = arith.constant 0.000000e+00 : f32
    %14 = vector.broadcast %cst_11 : f32 to vector<8x256xf32>
    %15 = arith.maximumf %13, %14 : vector<8x256xf32>
    %16 = arith.truncf %15 : vector<8x256xf32> to vector<8x256xbf16>
    %c0_12 = arith.constant 0 : index
    %c0_13 = arith.constant 0 : index
    %17 = vector.load %arg6[%c0_12, %c0_13] : memref<256x128xbf16, #tpu.memory_space<vmem>>, vector<256x128xbf16>
    %cst_14 = arith.constant dense<0.000000e+00> : vector<8x128xf32>
    %18 = tpu.matmul %16, %17, %cst_14 {dimension_numbers = #tpu.dot_dimension_numbers<[1], [0], [0], [1], [0, 0, 1, 1], [], []>} : vector<8x256xbf16>, vector<256x128xbf16>, vector<8x128xf32> -> vector<8x128xf32>
    %c0_15 = arith.constant 0 : index
    %c0_16 = arith.constant 0 : index
    %19 = vector.load %arg7[%c0_15, %c0_16] : memref<1x128xf32, #tpu.memory_space<vmem>>, vector<1x128xf32>
    %20 = vector.broadcast %19 : vector<1x128xf32> to vector<8x128xf32>
    %21 = arith.addf %18, %20 : vector<8x128xf32>
    %22 = arith.truncf %21 : vector<8x128xf32> to vector<8x128xbf16>
    %c0_17 = arith.constant 0 : index
    %c0_18 = arith.constant 0 : index
    %23 = vector.load %arg8[%c0_17, %c0_18] : memref<128x512xbf16, #tpu.memory_space<vmem>>, vector<128x512xbf16>
    %cst_19 = arith.constant dense<0.000000e+00> : vector<8x512xf32>
    %24 = tpu.matmul %22, %23, %cst_19 {dimension_numbers = #tpu.dot_dimension_numbers<[1], [0], [0], [1], [0, 0, 1, 1], [], []>} : vector<8x128xbf16>, vector<128x512xbf16>, vector<8x512xf32> -> vector<8x512xf32>
    %c0_20 = arith.constant 0 : index
    %c0_21 = arith.constant 0 : index
    %25 = vector.load %arg9[%c0_20, %c0_21] : memref<1x512xf32, #tpu.memory_space<vmem>>, vector<1x512xf32>
    %26 = vector.broadcast %25 : vector<1x512xf32> to vector<8x512xf32>
    %27 = arith.addf %24, %26 : vector<8x512xf32>
    %cst_22 = arith.constant 0.000000e+00 : f32
    %28 = vector.broadcast %cst_22 : f32 to vector<8x512xf32>
    %29 = arith.maximumf %27, %28 : vector<8x512xf32>
    %30 = arith.truncf %29 : vector<8x512xf32> to vector<8x512xbf16>
    %c0_23 = arith.constant 0 : index
    %c0_24 = arith.constant 0 : index
    %31 = vector.load %arg10[%c0_23, %c0_24] : memref<512x128xbf16, #tpu.memory_space<vmem>>, vector<512x128xbf16>
    %cst_25 = arith.constant dense<0.000000e+00> : vector<8x128xf32>
    %32 = tpu.matmul %30, %31, %cst_25 {dimension_numbers = #tpu.dot_dimension_numbers<[1], [0], [0], [1], [0, 0, 1, 1], [], []>} : vector<8x512xbf16>, vector<512x128xbf16>, vector<8x128xf32> -> vector<8x128xf32>
    %c0_26 = arith.constant 0 : index
    %c0_27 = arith.constant 0 : index
    %33 = vector.load %arg11[%c0_26, %c0_27] : memref<1x128xf32, #tpu.memory_space<vmem>>, vector<1x128xf32>
    %34 = vector.broadcast %33 : vector<1x128xf32> to vector<8x128xf32>
    %35 = arith.addf %32, %34 : vector<8x128xf32>
    %36 = math.tanh %35 : vector<8x128xf32>
    %c0_28 = arith.constant 0 : index
    %c0_29 = arith.constant 0 : index
    %37 = vector.load %arg12[%c0_28, %c0_29] : memref<8x128xf32, #tpu.memory_space<vmem>>, vector<8x128xf32>
    tpu.vector_store %arg12[%c0_28, %c0_29], %36 {strides = array<i32>} : memref<8x128xf32, #tpu.memory_space<vmem>>, vector<8x128xf32>,
    %c0_30 = arith.constant 0 : index
    %c0_31 = arith.constant 0 : index
    %38 = vector.load %arg13[%c0_30, %c0_31] : memref<8x128xf32, #tpu.memory_space<vmem>>, vector<8x128xf32>
    tpu.vector_store %arg13[%c0_30, %c0_31], %21 {strides = array<i32>} : memref<8x128xf32, #tpu.memory_space<vmem>>, vector<8x128xf32>,
    return
  }
  func.func @transform_0(%arg0: i32) -> (i32, i32) {
    %c0_i32 = arith.constant 0 : i32
    %c0_i32_0 = arith.constant 0 : i32
    return %arg0, %c0_i32 : i32, i32
  }
  func.func @transform_1(%arg0: i32) -> (i32, i32) {
    %c0_i32 = arith.constant 0 : i32
    %c0_i32_0 = arith.constant 0 : i32
    %c0_i32_1 = arith.constant 0 : i32
    return %c0_i32, %c0_i32_0 : i32, i32
  }
  func.func @transform_2(%arg0: i32) -> (i32, i32) {
    %c0_i32 = arith.constant 0 : i32
    %c0_i32_0 = arith.constant 0 : i32
    %c0_i32_1 = arith.constant 0 : i32
    return %c0_i32, %c0_i32_0 : i32, i32
  }
  func.func @transform_3(%arg0: i32) -> (i32, i32) {
    %c0_i32 = arith.constant 0 : i32
    %c0_i32_0 = arith.constant 0 : i32
    %c0_i32_1 = arith.constant 0 : i32
    return %c0_i32, %c0_i32_0 : i32, i32
  }
  func.func @transform_4(%arg0: i32) -> (i32, i32) {
    %c0_i32 = arith.constant 0 : i32
    %c0_i32_0 = arith.constant 0 : i32
    %c0_i32_1 = arith.constant 0 : i32
    return %c0_i32, %c0_i32_0 : i32, i32
  }
  func.func @transform_5(%arg0: i32) -> (i32, i32) {
    %c0_i32 = arith.constant 0 : i32
    %c0_i32_0 = arith.constant 0 : i32
    %c0_i32_1 = arith.constant 0 : i32
    return %c0_i32, %c0_i32_0 : i32, i32
  }
  func.func @transform_6(%arg0: i32) -> (i32, i32) {
    %c0_i32 = arith.constant 0 : i32
    %c0_i32_0 = arith.constant 0 : i32
    %c0_i32_1 = arith.constant 0 : i32
    return %c0_i32, %c0_i32_0 : i32, i32
  }
  func.func @transform_7(%arg0: i32) -> (i32, i32) {
    %c0_i32 = arith.constant 0 : i32
    %c0_i32_0 = arith.constant 0 : i32
    %c0_i32_1 = arith.constant 0 : i32
    return %c0_i32, %c0_i32_0 : i32, i32
  }
  func.func @transform_8(%arg0: i32) -> (i32, i32) {
    %c0_i32 = arith.constant 0 : i32
    %c0_i32_0 = arith.constant 0 : i32
    %c0_i32_1 = arith.constant 0 : i32
    return %c0_i32, %c0_i32_0 : i32, i32
  }
  func.func @transform_9(%arg0: i32) -> (i32, i32) {
    %c0_i32 = arith.constant 0 : i32
    %c0_i32_0 = arith.constant 0 : i32
    %c0_i32_1 = arith.constant 0 : i32
    return %c0_i32, %c0_i32_0 : i32, i32
  }
  func.func @transform_10(%arg0: i32) -> (i32, i32) {
    %c0_i32 = arith.constant 0 : i32
    %c0_i32_0 = arith.constant 0 : i32
    %c0_i32_1 = arith.constant 0 : i32
    return %c0_i32, %c0_i32_0 : i32, i32
  }
  func.func @transform_11(%arg0: i32) -> (i32, i32) {
    %c0_i32 = arith.constant 0 : i32
    %c0_i32_0 = arith.constant 0 : i32
    return %arg0, %c0_i32 : i32, i32
  }
  func.func @transform_12(%arg0: i32) -> (i32, i32) {
    %c0_i32 = arith.constant 0 : i32
    %c0_i32_0 = arith.constant 0 : i32
    return %arg0, %c0_i32 : i32, i32
  }
}

</mosaic_0001>

<bundles_post_ra>
// kernel: vae_forward.1
= control target key start
LH: loop header
LB: loop body
LE: loop exit
PB: predicated region body
PF: predicated region fallthrough
CT: control target
= control target key end

     0   :  { %s3475_s0 = inlined_call_operand.vmem [shape: bf16[8,128], index: 0, kind: input, shape index: {}]   ;;  %s3476_s1 = inlined_call_operand.vmem [shape: bf16[128,512], index: 1, kind: input, shape index: {}]   ;;  %s3477_s2 = inlined_call_operand.vmem [shape: f32[1,512], index: 2, kind: input, shape index: {}]   ;;  %s3478_s3 = inlined_call_operand.vmem [shape: bf16[512,256], index: 3, kind: input, shape index: {}]   ;;  %s3479_s4 = inlined_call_operand.vmem [shape: f32[1,256], index: 4, kind: input, shape index: {}]   ;;  %s3480_s5 = inlined_call_operand.vmem [shape: bf16[256,128], index: 5, kind: input, shape index: {}]   ;;  %s3481_s6 = inlined_call_operand.vmem [shape: f32[1,128], index: 6, kind: input, shape index: {}]   ;;  %s3482_s7 = inlined_call_operand.vmem [shape: bf16[128,512], index: 7, kind: input, shape index: {}]   ;;  %s3483_s8 = inlined_call_operand.vmem [shape: f32[1,512], index: 8, kind: input, shape index: {}]   ;;  %s3484_s9 = inlined_call_operand.vmem [shape: bf16[512,128], index: 9, kind: input, shape index: {}]   ;;  %s3485_s10 = inlined_call_operand.vmem [shape: f32[1,128], index: 10, kind: input, shape index: {}]   ;;  %s3486_s11 = inlined_call_operand.hbm [shape: f32[8,128], index: 11, kind: output, shape index: {0}]   ;;  %s3487_s12 = inlined_call_operand.vmem [shape: f32[8,128], index: 12, kind: output, shape index: {1}]  }
   0x1   :  { %v1672_v0 = vld [vmem:[%s3476_s1 + $0xe0] sm:$0xf]  ;;  %v2292_v1 = vld [vmem:[%s3476_s1 + $0xec] sm:$0xf0]  ;;  %v2290_v2 = vld [vmem:[%s3476_s1 + $0xe4] sm:$0xf] }
   0x2   :  { %v1673_v3 = vor.u32 %v2292_v1, %v1672_v0  ;;  %v1674_v4 = vld [vmem:[%s3476_s1 + $0xf0] sm:$0xf0]  ;;  %v1680_v5 = vld [vmem:[%s3476_s1 + $0xe8] sm:$0xf]  ;;  %v2293_v6 = vld [vmem:[%s3476_s1 + $0xf4] sm:$0xf0] }
   0x3   :  { %v1677_v7 = vor.u32 %v2290_v2, %v1674_v4  ;;  %v1681_v8 = vor.u32 %v2293_v6, %v1680_v5  ;;  %v2291_v9 = vld [vmem:[%s3476_s1 + $0xec] sm:$0xf]  ;;  %v1682_v10 = vld [vmem:[%s3476_s1 + $0xf8] sm:$0xf0]  ;;  %v1656_v11 = vld [vmem:[%s3476_s1 + $0xc0] sm:$0xf] }
   0x4   :  { %244 = vmatpush.bf16.msra.mxu0 %v1673_v3  ;;  %v1685_v12 = vor.u32 %v2291_v9, %v1682_v10  ;;  %v2288_v13 = vld [vmem:[%s3476_s1 + $0xcc] sm:$0xf0]  ;;  %v2286_v14 = vld [vmem:[%s3476_s1 + $0xc4] sm:$0xf]  ;;  %v1658_v15 = vld [vmem:[%s3476_s1 + $0xd0] sm:$0xf0] }
   0x5   :  { %257 = vmatpush.bf16.msra.mxu1 %v1677_v7  ;;  %270 = vmatpush.bf16.msra.mxu2 %v1681_v8  ;;  %v1657_v16 = vor.u32 %v2288_v13, %v1656_v11  ;;  %v1661_v17 = vor.u32 %v2286_v14, %v1658_v15  ;;  %v1664_v18 = vld [vmem:[%s3476_s1 + $0xc8] sm:$0xf]  ;;  %v2289_v19 = vld [vmem:[%s3476_s1 + $0xd4] sm:$0xf0]  ;;  %v2287_v20 = vld [vmem:[%s3476_s1 + $0xcc] sm:$0xf] }
   0x6   :  { %283 = vmatpush.bf16.msra.mxu3 %v1685_v12  ;;  %v1665_v21 = vor.u32 %v2289_v19, %v1664_v18  ;;  %v1666_v22 = vld [vmem:[%s3476_s1 + $0xd8] sm:$0xf0]  ;;  %v1640_v23 = vld [vmem:[%s3476_s1 + $0xa0] sm:$0xf]  ;;  %v2284_v24 = vld [vmem:[%s3476_s1 + $0xac] sm:$0xf0] }
   0x7   :  { %v1669_v25 = vor.u32 %v2287_v20, %v1666_v22  ;;  %v2282_v26 = vld [vmem:[%s3476_s1 + $0xa4] sm:$0xf]  ;;  %v1642_v27 = vld [vmem:[%s3476_s1 + $0xb0] sm:$0xf0]  ;;  %v1648_v28 = vld [vmem:[%s3476_s1 + $0xa8] sm:$0xf]  ;;  %v1641_v29 = vor.u32 %v2284_v24, %v1640_v23 }
   0x8   :  { %245 = vmatpush.bf16.msra.mxu0 %v1657_v16  ;;  %v2285_v30 = vld [vmem:[%s3476_s1 + $0xb4] sm:$0xf0]  ;;  %v2283_v31 = vld [vmem:[%s3476_s1 + $0xac] sm:$0xf]  ;;  %v1650_v32 = vld [vmem:[%s3476_s1 + $0xb8] sm:$0xf0]  ;;  %v1645_v33 = vor.u32 %v2282_v26, %v1642_v27 }
   0x9   :  { %258 = vmatpush.bf16.msra.mxu1 %v1661_v17  ;;  %271 = vmatpush.bf16.msra.mxu2 %v1665_v21  ;;  %v1649_v34 = vor.u32 %v2285_v30, %v1648_v28  ;;  %v1624_v35 = vld [vmem:[%s3476_s1 + $0x80] sm:$0xf]  ;;  %v2280_v36 = vld [vmem:[%s3476_s1 + $0x8c] sm:$0xf0]  ;;  %v2278_v37 = vld [vmem:[%s3476_s1 + $0x84] sm:$0xf]  ;;  %v1653_v38 = vor.u32 %v2283_v31, %v1650_v32 }
   0xa   :  { %284 = vmatpush.bf16.msra.mxu3 %v1669_v25  ;;  %v1626_v39 = vld [vmem:[%s3476_s1 + $0x90] sm:$0xf0]  ;;  %v1632_v40 = vld [vmem:[%s3476_s1 + $0x88] sm:$0xf]  ;;  %v2281_v41 = vld [vmem:[%s3476_s1 + $0x94] sm:$0xf0]  ;;  %v1625_v44 = vor.u32 %v2280_v36, %v1624_v35 }
   0xb   :  { %v2279_v42 = vld [vmem:[%s3476_s1 + $0x8c] sm:$0xf]  ;;  %v1634_v43 = vld [vmem:[%s3476_s1 + $0x98] sm:$0xf0]  ;;  %v1629_v45 = vor.u32 %v2278_v37, %v1626_v39  ;;  %v1633_v46 = vor.u32 %v2281_v41, %v1632_v40  ;;  %v1608_v47 = vld [vmem:[%s3476_s1 + $0x60] sm:$0xf] }
   0xc   :  { %246 = vmatpush.bf16.msra.mxu0 %v1641_v29  ;;  %v2276_v48 = vld [vmem:[%s3476_s1 + $0x6c] sm:$0xf0]  ;;  %v2274_v49 = vld [vmem:[%s3476_s1 + $0x64] sm:$0xf]  ;;  %v1637_v50 = vor.u32 %v2279_v42, %v1634_v43  ;;  %v1610_v51 = vld [vmem:[%s3476_s1 + $0x70] sm:$0xf0] }
   0xd   :  { %259 = vmatpush.bf16.msra.mxu1 %v1645_v33  ;;  %272 = vmatpush.bf16.msra.mxu2 %v1649_v34  ;;  %v1616_v52 = vld [vmem:[%s3476_s1 + $0x68] sm:$0xf]  ;;  %v2277_v53 = vld [vmem:[%s3476_s1 + $0x74] sm:$0xf0]  ;;  %v2275_v54 = vld [vmem:[%s3476_s1 + $0x6c] sm:$0xf]  ;;  %v1609_v56 = vor.u32 %v2276_v48, %v1608_v47  ;;  %v1613_v57 = vor.u32 %v2274_v49, %v1610_v51 }
   0xe   :  { %285 = vmatpush.bf16.msra.mxu3 %v1653_v38  ;;  %v1618_v55 = vld [vmem:[%s3476_s1 + $0x78] sm:$0xf0]  ;;  %v1617_v58 = vor.u32 %v2277_v53, %v1616_v52  ;;  %v1592_v59 = vld [vmem:[%s3476_s1 + $0x40] sm:$0xf]  ;;  %v2272_v60 = vld [vmem:[%s3476_s1 + $0x4c] sm:$0xf0] }
   0xf   :  { %v2270_v61 = vld [vmem:[%s3476_s1 + $0x44] sm:$0xf]  ;;  %v1621_v62 = vor.u32 %v2275_v54, %v1618_v55  ;;  %v1594_v63 = vld [vmem:[%s3476_s1 + $0x50] sm:$0xf0]  ;;  %v1600_v0 = vld [vmem:[%s3476_s1 + $0x48] sm:$0xf]  ;;  %v1593_v4 = vor.u32 %v2272_v60, %v1592_v59 }
  0x10   :  { %247 = vmatpush.bf16.msra.mxu0 %v1625_v44  ;;  %v2273_v1 = vld [vmem:[%s3476_s1 + $0x54] sm:$0xf0]  ;;  %v2271_v2 = vld [vmem:[%s3476_s1 + $0x4c] sm:$0xf]  ;;  %v1602_v3 = vld [vmem:[%s3476_s1 + $0x58] sm:$0xf0]  ;;  %v1597_v5 = vor.u32 %v2270_v61, %v1594_v63 }
  0x11   :  { %260 = vmatpush.bf16.msra.mxu1 %v1629_v45  ;;  %273 = vmatpush.bf16.msra.mxu2 %v1633_v46  ;;  %v1601_v6 = vor.u32 %v2273_v1, %v1600_v0  ;;  %v1576_v7 = vld [vmem:[%s3476_s1 + $0x20] sm:$0xf]  ;;  %v2268_v8 = vld [vmem:[%s3476_s1 + $0x2c] sm:$0xf0]  ;;  %v2266_v9 = vld [vmem:[%s3476_s1 + $0x24] sm:$0xf]  ;;  %v1605_v10 = vor.u32 %v2271_v2, %v1602_v3 }
  0x12   :  { %286 = vmatpush.bf16.msra.mxu3 %v1637_v50  ;;  %v1578_v11 = vld [vmem:[%s3476_s1 + $0x30] sm:$0xf0]  ;;  %v1584_v12 = vld [vmem:[%s3476_s1 + $0x28] sm:$0xf]  ;;  %v2269_v13 = vld [vmem:[%s3476_s1 + $0x34] sm:$0xf0]  ;;  %v1577_v16 = vor.u32 %v2268_v8, %v1576_v7 }
  0x13   :  { %v2267_v14 = vld [vmem:[%s3476_s1 + $0x2c] sm:$0xf]  ;;  %v1586_v15 = vld [vmem:[%s3476_s1 + $0x38] sm:$0xf0]  ;;  %v1560_v17 = vld [vmem:[%s3476_s1] sm:$0xf]  ;;  %v1581_v18 = vor.u32 %v2266_v9, %v1578_v11  ;;  %v1585_v19 = vor.u32 %v2269_v13, %v1584_v12 }
  0x14   :  { %248 = vmatpush.bf16.msra.mxu0 %v1609_v56  ;;  %v2264_v20 = vld [vmem:[%s3476_s1 + $0xc] sm:$0xf0]  ;;  %v2262_v21 = vld [vmem:[%s3476_s1 + $0x4] sm:$0xf]  ;;  %v1562_v22 = vld [vmem:[%s3476_s1 + $0x10] sm:$0xf0]  ;;  %v1589_v23 = vor.u32 %v2267_v14, %v1586_v15 }
  0x15   :  { %261 = vmatpush.bf16.msra.mxu1 %v1613_v57  ;;  %274 = vmatpush.bf16.msra.mxu2 %v1617_v58  ;;  %v1568_v24 = vld [vmem:[%s3476_s1 + $0x8] sm:$0xf]  ;;  %v2265_v25 = vld [vmem:[%s3476_s1 + $0x14] sm:$0xf0]  ;;  %v2263_v26 = vld [vmem:[%s3476_s1 + $0xc] sm:$0xf]  ;;  %v1561_v30 = vor.u32 %v2264_v20, %v1560_v17  ;;  %v1565_v33 = vor.u32 %v2262_v21, %v1562_v22 }
  0x16   :  { %287 = vmatpush.bf16.msra.mxu3 %v1621_v62  ;;  %v1570_v27 = vld [vmem:[%s3476_s1 + $0x18] sm:$0xf0]  ;;  %v1744_v28 = vld [vmem:[%s3478_s3 + $0x70] sm:$0xf]  ;;  %v2309_v29 = vld [vmem:[%s3478_s3 + $0x74] sm:$0xf0]  ;;  %v1569_v34 = vor.u32 %v2265_v25, %v1568_v24 }
  0x17   :  { %v1808_v31 = vld [vmem:[%s3478_s3 + $0xf0] sm:$0xf]  ;;  %v2325_v32 = vld [vmem:[%s3478_s3 + $0xf4] sm:$0xf0]  ;;  %v1573_v35 = vor.u32 %v2263_v26, %v1570_v27  ;;  %v1745_v36 = vor.u32 %v2309_v29, %v1744_v28  ;;  %v1736_v37 = vld [vmem:[%s3478_s3 + $0x60] sm:$0xf] }
  0x18   :  { %249 = vmatpush.bf16.msra.mxu0 %v1593_v4  ;;  %v1872_v38 = vld [vmem:[%s3478_s3 + $0x170] sm:$0xf]  ;;  %v2341_v39 = vld [vmem:[%s3478_s3 + $0x174] sm:$0xf0]  ;;  %v1809_v40 = vor.u32 %v2325_v32, %v1808_v31  ;;  %v2307_v41 = vld [vmem:[%s3478_s3 + $0x64] sm:$0xf0] }
  0x19   :  { %262 = vmatpush.bf16.msra.mxu1 %v1597_v5  ;;  %275 = vmatpush.bf16.msra.mxu2 %v1601_v6  ;;  %v1936_v42 = vld [vmem:[%s3478_s3 + $0x1f0] sm:$0xf]  ;;  %v2357_v43 = vld [vmem:[%s3478_s3 + $0x1f4] sm:$0xf0]  ;;  %v41_v44 = vld [vmem:[%s3475_s0] sm:$0xf]  ;;  %v1873_v47 = vor.u32 %v2341_v39, %v1872_v38  ;;  %v1737_v48 = vor.u32 %v2307_v41, %v1736_v37 }
  0x1a   :  { %288 = vmatpush.bf16.msra.mxu3 %v1605_v10  ;;  %v1800_v45 = vld [vmem:[%s3478_s3 + $0xe0] sm:$0xf]  ;;  %v2323_v46 = vld [vmem:[%s3478_s3 + $0xe4] sm:$0xf0]  ;;  %v1937_v49 = vor.u32 %v2357_v43, %v1936_v42  ;;  %v1728_v50 = vld [vmem:[%s3478_s3 + $0x50] sm:$0xf] }
  0x1b   :  { %v1864_v51 = vld [vmem:[%s3478_s3 + $0x160] sm:$0xf]  ;;  %v2339_v52 = vld [vmem:[%s3478_s3 + $0x164] sm:$0xf0]  ;;  %v1801_v53 = vor.u32 %v2323_v46, %v1800_v45  ;;  %v2305_v54 = vld [vmem:[%s3478_s3 + $0x54] sm:$0xf0] }
  0x1c   :  { %250 = vmatpush.bf16.msra.mxu0 %v1577_v16  ;;  %v1928_v55 = vld [vmem:[%s3478_s3 + $0x1e0] sm:$0xf]  ;;  %v2355_v56 = vld [vmem:[%s3478_s3 + $0x1e4] sm:$0xf0]  ;;  %v1792_v57 = vld [vmem:[%s3478_s3 + $0xd0] sm:$0xf]  ;;  %v1865_v59 = vor.u32 %v2339_v52, %v1864_v51  ;;  %v1729_v60 = vor.u32 %v2305_v54, %v1728_v50 }
  0x1d   :  { %263 = vmatpush.bf16.msra.mxu1 %v1581_v18  ;;  %276 = vmatpush.bf16.msra.mxu2 %v1585_v19  ;;  %v2321_v58 = vld [vmem:[%s3478_s3 + $0xd4] sm:$0xf0]  ;;  %v1929_v61 = vor.u32 %v2355_v56, %v1928_v55  ;;  %v1720_v62 = vld [vmem:[%s3478_s3 + $0x40] sm:$0xf]  ;;  %v1856_v63 = vld [vmem:[%s3478_s3 + $0x150] sm:$0xf] }
  0x1e   :  { %289 = vmatpush.bf16.msra.mxu3 %v1589_v23  ;;  %v2337_v0 = vld [vmem:[%s3478_s3 + $0x154] sm:$0xf0]  ;;  %v1793_v1 = vor.u32 %v2321_v58, %v1792_v57  ;;  %v2303_v2 = vld [vmem:[%s3478_s3 + $0x44] sm:$0xf0]  ;;  %v1920_v3 = vld [vmem:[%s3478_s3 + $0x1d0] sm:$0xf] }
  0x1f   :  { %v2353_v4 = vld [vmem:[%s3478_s3 + $0x1d4] sm:$0xf0]  ;;  %v1784_v5 = vld [vmem:[%s3478_s3 + $0xc0] sm:$0xf]  ;;  %v2319_v6 = vld [vmem:[%s3478_s3 + $0xc4] sm:$0xf0]  ;;  %v1857_v7 = vor.u32 %v2337_v0, %v1856_v63  ;;  %v1721_v8 = vor.u32 %v2303_v2, %v1720_v62 }
  0x20   :  { %251 = vmatpush.bf16.msra.mxu0 %v1561_v30  ;;  %v1921_v9 = vor.u32 %v2353_v4, %v1920_v3  ;;  %v1712_v10 = vld [vmem:[%s3478_s3 + $0x30] sm:$0xf]  ;;  %v1848_v11 = vld [vmem:[%s3478_s3 + $0x140] sm:$0xf]  ;;  %v2335_v12 = vld [vmem:[%s3478_s3 + $0x144] sm:$0xf0]  ;;  %v1785_v13 = vor.u32 %v2319_v6, %v1784_v5 }
  0x21   :  { %264 = vmatpush.bf16.msra.mxu1 %v1565_v33  ;;  %277 = vmatpush.bf16.msra.mxu2 %v1569_v34  ;;  %v2301_v14 = vld [vmem:[%s3478_s3 + $0x34] sm:$0xf0]  ;;  %v1912_v15 = vld [vmem:[%s3478_s3 + $0x1c0] sm:$0xf]  ;;  %v2351_v16 = vld [vmem:[%s3478_s3 + $0x1c4] sm:$0xf0]  ;;  %v1849_v19 = vor.u32 %v2335_v12, %v1848_v11 }
  0x22   :  { %290 = vmatpush.bf16.msra.mxu3 %v1573_v35  ;;  %v1776_v17 = vld [vmem:[%s3478_s3 + $0xb0] sm:$0xf]  ;;  %v2317_v18 = vld [vmem:[%s3478_s3 + $0xb4] sm:$0xf0]  ;;  %v1704_v20 = vld [vmem:[%s3478_s3 + $0x20] sm:$0xf]  ;;  %v1713_v21 = vor.u32 %v2301_v14, %v1712_v10  ;;  %v1913_v22 = vor.u32 %v2351_v16, %v1912_v15 }
  0x23   :  { %252 = vmatmul.bf16.vlgmr.msra.gmra.mxu0 %v41_v44  ;;  %v2299_v23 = vld [vmem:[%s3478_s3 + $0x24] sm:$0xf0]  ;;  %v1840_v24 = vld [vmem:[%s3478_s3 + $0x130] sm:$0xf]  ;;  %v2333_v25 = vld [vmem:[%s3478_s3 + $0x134] sm:$0xf0]  ;;  %v1777_v26 = vor.u32 %v2317_v18, %v1776_v17 }
  0x24   :  { %694 = vmatpush.bf16.msrb.mxu0 %v1745_v36  ;;  %265 = vmatmul.bf16.vlgmr.msra.gmra.mxu1 %v41_v44  ;;  %v1768_v27 = vld [vmem:[%s3478_s3 + $0xa0] sm:$0xf]  ;;  %v1904_v28 = vld [vmem:[%s3478_s3 + $0x1b0] sm:$0xf]  ;;  %v2349_v29 = vld [vmem:[%s3478_s3 + $0x1b4] sm:$0xf0]  ;;  %v1841_v31 = vor.u32 %v2333_v25, %v1840_v24 }
  0x25   :  { %707 = vmatpush.bf16.msrb.mxu1 %v1809_v40  ;;  %278 = vmatmul.bf16.vlgmr.msra.gmra.mxu2 %v41_v44  ;;  %v2315_v30 = vld [vmem:[%s3478_s3 + $0xa4] sm:$0xf0] }
  0x26   :  { %291 = vmatmul.bf16.vlgmr.msra.gmra.mxu3 %v41_v44  ;;  %720 = vmatpush.bf16.msrb.mxu2 %v1873_v47 }
  0x27   :  { %733 = vmatpush.bf16.msrb.mxu3 %v1937_v49 }
  0x28   :  { %695 = vmatpush.bf16.msrb.mxu0 %v1737_v48 }
  0x29   :  { %708 = vmatpush.bf16.msrb.mxu1 %v1801_v53 }
  0x2a   :  { %721 = vmatpush.bf16.msrb.mxu2 %v1865_v59 }
  0x2b   :  { %734 = vmatpush.bf16.msrb.mxu3 %v1929_v61 }
  0x2c   :  { %696 = vmatpush.bf16.msrb.mxu0 %v1729_v60 }
  0x2d   :  { %709 = vmatpush.bf16.msrb.mxu1 %v1793_v1 }
  0x2e   :  { %722 = vmatpush.bf16.msrb.mxu2 %v1857_v7 }
  0x2f   :  { %735 = vmatpush.bf16.msrb.mxu3 %v1921_v9 }
  0x30   :  { %697 = vmatpush.bf16.msrb.mxu0 %v1721_v8 }
  0x31   :  { %710 = vmatpush.bf16.msrb.mxu1 %v1785_v13 }
  0x32   :  { %723 = vmatpush.bf16.msrb.mxu2 %v1849_v19 }
  0x33   :  { %18 = vsyncpa [#allocation3], 0  ;;  %736 = vmatpush.bf16.msrb.mxu3 %v1913_v22  ;;  %v1705_v32 = vor.u32 %v2299_v23, %v1704_v20  ;;  %v1905_v33 = vor.u32 %v2349_v29, %v1904_v28  ;;  %v1696_v34 = vld [vmem:[%s3478_s3 + $0x10] sm:$0xf]  ;;  %v1832_v35 = vld [vmem:[%s3478_s3 + $0x120] sm:$0xf]  ;;  %v1769_v37 = vor.u32 %v2315_v30, %v1768_v27 }
  0x34   :  { %698 = vmatpush.bf16.msrb.mxu0 %v1713_v21  ;;  %v2331_v36 = vld [vmem:[%s3478_s3 + $0x124] sm:$0xf0]  ;;  %v2297_v38 = vld [vmem:[%s3478_s3 + $0x14] sm:$0xf0]  ;;  %v1896_v39 = vld [vmem:[%s3478_s3 + $0x1a0] sm:$0xf] }
  0x35   :  { %711 = vmatpush.bf16.msrb.mxu1 %v1777_v26  ;;  %v2347_v40 = vld [vmem:[%s3478_s3 + $0x1a4] sm:$0xf0]  ;;  %v1760_v41 = vld [vmem:[%s3478_s3 + $0x90] sm:$0xf]  ;;  %v2313_v42 = vld [vmem:[%s3478_s3 + $0x94] sm:$0xf0]  ;;  %v1833_v43 = vor.u32 %v2331_v36, %v1832_v35  ;;  %v1697_v45 = vor.u32 %v2297_v38, %v1696_v34 }
  0x36   :  { %724 = vmatpush.bf16.msrb.mxu2 %v1841_v31  ;;  %v1688_v44 = vld [vmem:[%s3478_s3] sm:$0xf]  ;;  %v1897_v46 = vor.u32 %v2347_v40, %v1896_v39  ;;  %v2295_v47 = vld [vmem:[%s3478_s3 + $0x4] sm:$0xf0]  ;;  %v1824_v48 = vld [vmem:[%s3478_s3 + $0x110] sm:$0xf]  ;;  %v1761_v50 = vor.u32 %v2313_v42, %v1760_v41 }
  0x37   :  { %737 = vmatpush.bf16.msrb.mxu3 %v1905_v33  ;;  %v2329_v49 = vld [vmem:[%s3478_s3 + $0x114] sm:$0xf0]  ;;  %v1752_v51 = vld [vmem:[%s3478_s3 + $0x80] sm:$0xf]  ;;  %v1888_v52 = vld [vmem:[%s3478_s3 + $0x190] sm:$0xf]  ;;  %v1689_v60 = vor.u32 %v2295_v47, %v1688_v44 }
  0x38   :  { %699 = vmatpush.bf16.msrb.mxu0 %v1705_v32  ;;  %v2345_v53 = vld [vmem:[%s3478_s3 + $0x194] sm:$0xf0]  ;;  %v2311_v54 = vld [vmem:[%s3478_s3 + $0x84] sm:$0xf0]  ;;  %v2308_v55 = vld [vmem:[%s3478_s3 + $0x74] sm:$0xf]  ;;  %v1825_v59 = vor.u32 %v2329_v49, %v1824_v48 }
  0x39   :  { %712 = vmatpush.bf16.msrb.mxu1 %v1769_v37  ;;  %v1746_v56 = vld [vmem:[%s3478_s3 + $0x78] sm:$0xf0]  ;;  %v2324_v57 = vld [vmem:[%s3478_s3 + $0xf4] sm:$0xf]  ;;  %v1889_v61 = vor.u32 %v2345_v53, %v1888_v52  ;;  %v2306_v62 = vld [vmem:[%s3478_s3 + $0x64] sm:$0xf]  ;;  %v1753_v2 = vor.u32 %v2311_v54, %v1752_v51 }
  0x3a   :  { %725 = vmatpush.bf16.msrb.mxu2 %v1833_v43  ;;  %v1810_v58 = vld [vmem:[%s3478_s3 + $0xf8] sm:$0xf0]  ;;  %v1816_v63 = vld [vmem:[%s3478_s3 + $0x100] sm:$0xf]  ;;  %v2327_v0 = vld [vmem:[%s3478_s3 + $0x104] sm:$0xf0]  ;;  %v1749_v3 = vor.u32 %v2308_v55, %v1746_v56 }
  0x3b   :  { %738 = vmatpush.bf16.msrb.mxu3 %v1897_v46  ;;  %v1880_v1 = vld [vmem:[%s3478_s3 + $0x180] sm:$0xf]  ;;  %v2343_v4 = vld [vmem:[%s3478_s3 + $0x184] sm:$0xf0]  ;;  %v2340_v5 = vld [vmem:[%s3478_s3 + $0x174] sm:$0xf]  ;;  %v1813_v7 = vor.u32 %v2324_v57, %v1810_v58  ;;  %v1817_v13 = vor.u32 %v2327_v0, %v1816_v63 }
  0x3c   :  { %700 = vmatpush.bf16.msrb.mxu0 %v1697_v45  ;;  %v1874_v6 = vld [vmem:[%s3478_s3 + $0x178] sm:$0xf0]  ;;  %v1738_v8 = vld [vmem:[%s3478_s3 + $0x68] sm:$0xf0]  ;;  %v2356_v9 = vld [vmem:[%s3478_s3 + $0x1f4] sm:$0xf]  ;;  %v1881_v14 = vor.u32 %v2343_v4, %v1880_v1 }
  0x3d   :  { %713 = vmatpush.bf16.msrb.mxu1 %v1761_v50  ;;  %v1938_v10 = vld [vmem:[%s3478_s3 + $0x1f8] sm:$0xf0]  ;;  %v2322_v11 = vld [vmem:[%s3478_s3 + $0xe4] sm:$0xf]  ;;  %v1802_v12 = vld [vmem:[%s3478_s3 + $0xe8] sm:$0xf0]  ;;  %v1877_v15 = vor.u32 %v2340_v5, %v1874_v6  ;;  %v1741_v16 = vor.u32 %v2306_v62, %v1738_v8 }
  0x3e   :  { %726 = vmatpush.bf16.msrb.mxu2 %v1825_v59  ;;  %v1941_v17 = vor.u32 %v2356_v9, %v1938_v10  ;;  %v1805_v18 = vor.u32 %v2322_v11, %v1802_v12  ;;  %v2304_v19 = vld [vmem:[%s3478_s3 + $0x54] sm:$0xf]  ;;  %v1730_v20 = vld [vmem:[%s3478_s3 + $0x58] sm:$0xf0]  ;;  %v2338_v25 = vld [vmem:[%s3478_s3 + $0x164] sm:$0xf] }
  0x3f   :  { %739 = vmatpush.bf16.msrb.mxu3 %v1889_v61  ;;  %v2320_v21 = vld [vmem:[%s3478_s3 + $0xd4] sm:$0xf]  ;;  %v1733_v22 = vor.u32 %v2304_v19, %v1730_v20  ;;  %v1794_v23 = vld [vmem:[%s3478_s3 + $0xd8] sm:$0xf0]  ;;  %v1866_v26 = vld [vmem:[%s3478_s3 + $0x168] sm:$0xf0] }
  0x40   :  { %701 = vmatpush.bf16.msrb.mxu0 %v1689_v60  ;;  %v1797_v24 = vor.u32 %v2320_v21, %v1794_v23  ;;  %v1869_v27 = vor.u32 %v2338_v25, %v1866_v26  ;;  %v2354_v28 = vld [vmem:[%s3478_s3 + $0x1e4] sm:$0xf]  ;;  %v1930_v29 = vld [vmem:[%s3478_s3 + $0x1e8] sm:$0xf0]  ;;  %v2336_v37 = vld [vmem:[%s3478_s3 + $0x154] sm:$0xf] }
  0x41   :  { %714 = vmatpush.bf16.msrb.mxu1 %v1753_v2  ;;  %v1933_v30 = vor.u32 %v2354_v28, %v1930_v29  ;;  %v2302_v31 = vld [vmem:[%s3478_s3 + $0x44] sm:$0xf]  ;;  %v1722_v32 = vld [vmem:[%s3478_s3 + $0x48] sm:$0xf0]  ;;  %v1858_v38 = vld [vmem:[%s3478_s3 + $0x158] sm:$0xf0] }
  0x42   :  { %727 = vmatpush.bf16.msrb.mxu2 %v1817_v13  ;;  %v2318_v33 = vld [vmem:[%s3478_s3 + $0xc4] sm:$0xf]  ;;  %v1725_v34 = vor.u32 %v2302_v31, %v1722_v32  ;;  %v1786_v35 = vld [vmem:[%s3478_s3 + $0xc8] sm:$0xf0]  ;;  %v2352_v39 = vld [vmem:[%s3478_s3 + $0x1d4] sm:$0xf]  ;;  %v1861_v40 = vor.u32 %v2336_v37, %v1858_v38 }
  0x43   :  { %740 = vmatpush.bf16.msrb.mxu3 %v1881_v14  ;;  %v1789_v36 = vor.u32 %v2318_v33, %v1786_v35  ;;  %v1922_v41 = vld [vmem:[%s3478_s3 + $0x1d8] sm:$0xf0]  ;;  %v2300_v43 = vld [vmem:[%s3478_s3 + $0x34] sm:$0xf]  ;;  %v2334_v49 = vld [vmem:[%s3478_s3 + $0x144] sm:$0xf] }
  0x44   :  { %746 = vmatpush.bf16.msra.mxu0 %v1749_v3  ;;  %v1925_v42 = vor.u32 %v2352_v39, %v1922_v41  ;;  %v1714_v44 = vld [vmem:[%s3478_s3 + $0x38] sm:$0xf0]  ;;  %v2316_v46 = vld [vmem:[%s3478_s3 + $0xb4] sm:$0xf]  ;;  %v1850_v50 = vld [vmem:[%s3478_s3 + $0x148] sm:$0xf0] }
  0x45   :  { %759 = vmatpush.bf16.msra.mxu1 %v1813_v7  ;;  %v1717_v45 = vor.u32 %v2300_v43, %v1714_v44  ;;  %v1778_v47 = vld [vmem:[%s3478_s3 + $0xb8] sm:$0xf0]  ;;  %v2350_v51 = vld [vmem:[%s3478_s3 + $0x1c4] sm:$0xf]  ;;  %v1853_v52 = vor.u32 %v2334_v49, %v1850_v50  ;;  %v1914_v53 = vld [vmem:[%s3478_s3 + $0x1c8] sm:$0xf0] }
  0x46   :  { %772 = vmatpush.bf16.msra.mxu2 %v1877_v15  ;;  %v1781_v48 = vor.u32 %v2316_v46, %v1778_v47  ;;  %v1917_v54 = vor.u32 %v2350_v51, %v1914_v53  ;;  %v2298_v55 = vld [vmem:[%s3478_s3 + $0x24] sm:$0xf]  ;;  %v1706_v56 = vld [vmem:[%s3478_s3 + $0x28] sm:$0xf0]  ;;  %v2332_v61 = vld [vmem:[%s3478_s3 + $0x134] sm:$0xf] }
  0x47   :  { %785 = vmatpush.bf16.msra.mxu3 %v1941_v17  ;;  %v2314_v57 = vld [vmem:[%s3478_s3 + $0xa4] sm:$0xf]  ;;  %v1709_v58 = vor.u32 %v2298_v55, %v1706_v56  ;;  %v1770_v59 = vld [vmem:[%s3478_s3 + $0xa8] sm:$0xf0]  ;;  %v1842_v62 = vld [vmem:[%s3478_s3 + $0x138] sm:$0xf0] }
  0x48   :  { %747 = vmatpush.bf16.msra.mxu0 %v1741_v16  ;;  %v1773_v60 = vor.u32 %v2314_v57, %v1770_v59  ;;  %v2348_v63 = vld [vmem:[%s3478_s3 + $0x1b4] sm:$0xf]  ;;  %v1845_v0 = vor.u32 %v2332_v61, %v1842_v62  ;;  %v1906_v1 = vld [vmem:[%s3478_s3 + $0x1b8] sm:$0xf0]  ;;  %v2330_v8 = vld [vmem:[%s3478_s3 + $0x124] sm:$0xf] }
  0x49   :  { %760 = vmatpush.bf16.msra.mxu1 %v1805_v18  ;;  %v1909_v2 = vor.u32 %v2348_v63, %v1906_v1  ;;  %v2296_v3 = vld [vmem:[%s3478_s3 + $0x14] sm:$0xf]  ;;  %v1698_v4 = vld [vmem:[%s3478_s3 + $0x18] sm:$0xf0]  ;;  %v1834_v9 = vld [vmem:[%s3478_s3 + $0x128] sm:$0xf0] }
  0x4a   :  { %773 = vmatpush.bf16.msra.mxu2 %v1869_v27  ;;  %v2312_v5 = vld [vmem:[%s3478_s3 + $0x94] sm:$0xf]  ;;  %v1701_v6 = vor.u32 %v2296_v3, %v1698_v4  ;;  %v1762_v7 = vld [vmem:[%s3478_s3 + $0x98] sm:$0xf0]  ;;  %v1837_v11 = vor.u32 %v2330_v8, %v1834_v9  ;;  %v2346_v12 = vld [vmem:[%s3478_s3 + $0x1a4] sm:$0xf] }
  0x4b   :  { %786 = vmatpush.bf16.msra.mxu3 %v1933_v30  ;;  %v1765_v10 = vor.u32 %v2312_v5, %v1762_v7  ;;  %v1898_v13 = vld [vmem:[%s3478_s3 + $0x1a8] sm:$0xf0]  ;;  %v2294_v14 = vld [vmem:[%s3478_s3 + $0x4] sm:$0xf]  ;;  %v2328_v21 = vld [vmem:[%s3478_s3 + $0x114] sm:$0xf] }
  0x4c   :  { %748 = vmatpush.bf16.msra.mxu0 %v1733_v22  ;;  %v1901_v15 = vor.u32 %v2346_v12, %v1898_v13  ;;  %v1690_v16 = vld [vmem:[%s3478_s3 + $0x8] sm:$0xf0]  ;;  %v2310_v17 = vld [vmem:[%s3478_s3 + $0x84] sm:$0xf]  ;;  %v1826_v22 = vld [vmem:[%s3478_s3 + $0x118] sm:$0xf0] }
  0x4d   :  { %761 = vmatpush.bf16.msra.mxu1 %v1797_v24  ;;  %v1754_v18 = vld [vmem:[%s3478_s3 + $0x88] sm:$0xf0]  ;;  %v1693_v19 = vor.u32 %v2294_v14, %v1690_v16  ;;  %v2344_v23 = vld [vmem:[%s3478_s3 + $0x194] sm:$0xf]  ;;  %v1829_v24 = vor.u32 %v2328_v21, %v1826_v22  ;;  %v1890_v25 = vld [vmem:[%s3478_s3 + $0x198] sm:$0xf0] }
  0x4e   :  { %774 = vmatpush.bf16.msra.mxu2 %v1861_v40  ;;  %v1757_v20 = vor.u32 %v2310_v17, %v1754_v18  ;;  %v1893_v26 = vor.u32 %v2344_v23, %v1890_v25  ;;  %v2326_v27 = vld [vmem:[%s3478_s3 + $0x104] sm:$0xf]  ;;  %v1818_v28 = vld [vmem:[%s3478_s3 + $0x108] sm:$0xf0]  ;;  %v74_v32 = vld [vmem:[%s3477_s2] sm:$0xf] }
  0x4f   :  { %787 = vmatpush.bf16.msra.mxu3 %v1925_v42  ;;  %v2342_v29 = vld [vmem:[%s3478_s3 + $0x184] sm:$0xf]  ;;  %v1821_v30 = vor.u32 %v2326_v27, %v1818_v28  ;;  %v1882_v31 = vld [vmem:[%s3478_s3 + $0x188] sm:$0xf0]  ;;  %v77_v35 = vperm.slane %v74_v32, 1  ;;  %v78_v42 = vperm.slane %v74_v32, 2 }
  0x50   :  { %749 = vmatpush.bf16.msra.mxu0 %v1725_v34  ;;  %v1885_v33 = vor.u32 %v2342_v29, %v1882_v31  ;;  %v76_v34 = vperm.slane %v74_v32, 0  ;;  %v2365_v43 = vld [vmem:[%s3480_s5 + $0x38] sm:$0xff]  ;;  %v2364_v51 = vld [vmem:[%s3480_s5 + $0x30] sm:$0xff]  ;;  %v2363_v57 = vld [vmem:[%s3480_s5 + $0x28] sm:$0xff]  ;;  %s2469_s15 = smov [#allocation2]   ;;  %s1545_s18 = sshll.u32 %s3486_s11, 4  ;;  %s1546_s18 = int_to_ptr.hbm [resolvable:$true] %s1545_s18 }
  0x51   :  { %762 = vmatpush.bf16.msra.mxu1 %v1789_v36  ;;  %v2362_v61 = vld [vmem:[%s3480_s5 + $0x20] sm:$0xff]  ;;  %v2373_v62 = vld [vmem:[%s3480_s5 + $0x78] sm:$0xff]  ;;  %v2372_v1 = vld [vmem:[%s3480_s5 + $0x70] sm:$0xff]  ;;  %s1543_s16 = sshll.u32 %s2469_s15, 4  ;;  %s1544_s16 = int_to_ptr.vmem [resolvable:$true] %s1543_s16 }
  0x52   :  { %775 = vmatpush.bf16.msra.mxu2 %v1853_v52  ;;  %v2361_v63 = vld [vmem:[%s3480_s5 + $0x18] sm:$0xff]  ;;  %v2371_v3 = vld [vmem:[%s3480_s5 + $0x68] sm:$0xff]  ;;  %v2358_v4 = vld [vmem:[%s3480_s5] sm:$0xff] }
  0x53   :  { %788 = vmatpush.bf16.msra.mxu3 %v1917_v54  ;;  %v2370_v5 = vld [vmem:[%s3480_s5 + $0x60] sm:$0xff]  ;;  %v2368_v7 = vld [vmem:[%s3480_s5 + $0x50] sm:$0xff]  ;;  %v2367_v8 = vld [vmem:[%s3480_s5 + $0x48] sm:$0xff] }
  0x54   :  { %750 = vmatpush.bf16.msra.mxu0 %v1717_v45  ;;  %v79_v45 = vperm.slane %v74_v32, 3  ;;  %v3165_v9 = vld [vmem:[%s3479_s4] sm:$0x3]  ;;  %v2404_v16 = vld [vmem:[%s3482_s7 + $0xec] sm:$0xf0] }
  0x55   :  { %763 = vmatpush.bf16.msra.mxu1 %v1781_v48  ;;  %v370_v12 = vperm.slane %v3165_v9, 0  ;;  %v2366_v13 = vld [vmem:[%s3480_s5 + $0x40] sm:$0xff]  ;;  %v2405_v21 = vld [vmem:[%s3482_s7 + $0xf4] sm:$0xf0]  ;;  %v2403_v25 = vld [vmem:[%s3482_s7 + $0xec] sm:$0xf] }
  0x56   :  { %776 = vmatpush.bf16.msra.mxu2 %v1845_v0  ;;  %v2360_v0 = vld [vmem:[%s3480_s5 + $0x10] sm:$0xff]  ;;  %v2402_v17 = vld [vmem:[%s3482_s7 + $0xe4] sm:$0xf]  ;;  %v2104_v27 = vld [vmem:[%s3482_s7 + $0xc0] sm:$0xf] }
  0x57   :  { %789 = vmatpush.bf16.msra.mxu3 %v1909_v2  ;;  %v2359_v2 = vld [vmem:[%s3480_s5 + $0x8] sm:$0xff]  ;;  %v2398_v31 = vld [vmem:[%s3482_s7 + $0xc4] sm:$0xf]  ;;  %v2106_v32 = vld [vmem:[%s3482_s7 + $0xd0] sm:$0xf0] }
  0x58   :  { %751 = vmatpush.bf16.msra.mxu0 %v1709_v58 }
  0x59   :  { %764 = vmatpush.bf16.msra.mxu1 %v1773_v60 }
  0x5a   :  { %777 = vmatpush.bf16.msra.mxu2 %v1837_v11 }
  0x5b   :  { %790 = vmatpush.bf16.msra.mxu3 %v1901_v15  ;;  %v2120_v15 = vld [vmem:[%s3482_s7 + $0xe0] sm:$0xf] }
  0x5c   :  { %752 = vmatpush.bf16.msra.mxu0 %v1701_v6  ;;  %v2369_v6 = vld [vmem:[%s3480_s5 + $0x58] sm:$0xff]  ;;  %v2121_v18 = vor.u32 %v2404_v16, %v2120_v15  ;;  %v2390_v15 = vld [vmem:[%s3482_s7 + $0x84] sm:$0xf] }
  0x5d   :  { %765 = vmatpush.bf16.msra.mxu1 %v1765_v10 }
  0x5e   :  { %778 = vmatpush.bf16.msra.mxu2 %v1829_v24 }
  0x5f   :  { %791 = vmatpush.bf16.msra.mxu3 %v1893_v26  ;;  %v2130_v26 = vld [vmem:[%s3482_s7 + $0xf8] sm:$0xf0] }
  0x60   :  { %753 = vmatpush.bf16.msra.mxu0 %v1693_v19  ;;  %v2122_v19 = vld [vmem:[%s3482_s7 + $0xf0] sm:$0xf0]  ;;  %v2133_v29 = vor.u32 %v2403_v25, %v2130_v26  ;;  %v2388_v26 = vld [vmem:[%s3482_s7 + $0x6c] sm:$0xf0] }
  0x61   :  { %766 = vmatpush.bf16.msra.mxu1 %v1757_v20  ;;  %v2128_v20 = vld [vmem:[%s3482_s7 + $0xe8] sm:$0xf]  ;;  %v2125_v23 = vor.u32 %v2402_v17, %v2122_v19  ;;  %v2074_v17 = vld [vmem:[%s3482_s7 + $0x90] sm:$0xf0]  ;;  %v2393_v19 = vld [vmem:[%s3482_s7 + $0x94] sm:$0xf0] }
  0x62   :  { %779 = vmatpush.bf16.msra.mxu2 %v1821_v30  ;;  %v2129_v24 = vor.u32 %v2405_v21, %v2128_v20  ;;  %v2400_v30 = vld [vmem:[%s3482_s7 + $0xcc] sm:$0xf0]  ;;  %v2077_v20 = vor.u32 %v2390_v15, %v2074_v17  ;;  %v2427_v17 = vld [vmem:[%s3484_s9 + $0xa8] sm:$0xff] }
  0x63   :  { %792 = vmatpush.bf16.msra.mxu3 %v1885_v33  ;;  %v2412_v15 = vld [vmem:[%s3484_s9 + $0x30] sm:$0xff] }
  0xa0   :  { %v253_v36 = vpop.f32.mrf.mxu0 }
  0xa1   :  { %v254_v37 = vadd.f32 %v253_v36, %v76_v34  ;;  %v266_v38 = vpop.f32.mrf.mxu1  ;;  %v2105_v34 = vor.u32 %v2400_v30, %v2104_v27  ;;  %v2112_v36 = vld [vmem:[%s3482_s7 + $0xc8] sm:$0xf]  ;;  %v2386_v27 = vld [vmem:[%s3482_s7 + $0x64] sm:$0xf] }
  0xa2   :  { %v267_v39 = vadd.f32 %v266_v38, %v77_v35  ;;  %v2109_v35 = vor.u32 %v2398_v31, %v2106_v32  ;;  %v2399_v38 = vld [vmem:[%s3482_s7 + $0xcc] sm:$0xf]  ;;  %v2064_v31 = vld [vmem:[%s3482_s7 + $0x68] sm:$0xf]  ;;  %v2389_v32 = vld [vmem:[%s3482_s7 + $0x74] sm:$0xf0] }
  0xa3   :  { %v296_v40 = vmax.f32 %v254_v37, 0.0  ;;  %v2401_v37 = vld [vmem:[%s3482_s7 + $0xd4] sm:$0xf0] }
  0xa4   :  { %v297_v41 = vmax.f32 %v267_v39, 0.0  ;;  %v2113_v39 = vor.u32 %v2401_v37, %v2112_v36  ;;  %v2040_v37 = vld [vmem:[%s3482_s7 + $0x40] sm:$0xf] }
  0xa5   :  { %v300_v44 = vpack.c.bf16 %v296_v40, %v296_v40  ;;  %v2114_v40 = vld [vmem:[%s3482_s7 + $0xd8] sm:$0xf0] }
  0xa6   :  { %v301_v46 = vpack.c.bf16 %v297_v41, %v297_v41  ;;  %v2088_v41 = vld [vmem:[%s3482_s7 + $0xa0] sm:$0xf] }
  0xa7   :  { %702 = vmatmul.bf16.vlgmr.msrb.gmra.mxu0 %v300_v44 }
  0xa8   :  { %v279_v47 = vpop.f32.mrf.mxu2  ;;  %715 = vmatmul.bf16.vlgmr.msrb.gmra.mxu1 %v301_v46  ;;  %v255_v50 = vpop.f32.mrf.mxu0  ;;  %934 = vmatpush.bf16.msrb.mxu0 %v2365_v43  ;;  %v2117_v43 = vor.u32 %v2399_v38, %v2114_v40  ;;  %v2384_v38 = vld [vmem:[%s3482_s7 + $0x4c] sm:$0xf0] }
  0xa9   :  { %v280_v48 = vadd.f32 %v279_v47, %v78_v42  ;;  %v292_v49 = vpop.f32.mrf.mxu3  ;;  %v268_v53 = vpop.f32.mrf.mxu1  ;;  %947 = vmatpush.bf16.msrb.mxu1 %v2373_v62  ;;  %v2396_v42 = vld [vmem:[%s3482_s7 + $0xac] sm:$0xf0]  ;;  %v2395_v50 = vld [vmem:[%s3482_s7 + $0xac] sm:$0xf]  ;;  %v371_v62 = vperm.slane %v3165_v9, 1  ;;  %v2041_v40 = vor.u32 %v2384_v38, %v2040_v37 }
  0xaa   :  { %v293_v52 = vadd.f32 %v292_v49, %v79_v45  ;;  %v2090_v45 = vld [vmem:[%s3482_s7 + $0xb0] sm:$0xf0]  ;;  %v2397_v49 = vld [vmem:[%s3482_s7 + $0xb4] sm:$0xf0]  ;;  %v2072_v9 = vld [vmem:[%s3482_s7 + $0x80] sm:$0xf] }
  0xab   :  { %v298_v54 = vmax.f32 %v280_v48, 0.0  ;;  %v2089_v48 = vor.u32 %v2396_v42, %v2088_v41  ;;  %v2042_v41 = vld [vmem:[%s3482_s7 + $0x50] sm:$0xf0]  ;;  %v2048_v42 = vld [vmem:[%s3482_s7 + $0x48] sm:$0xf] }
  0xac   :  { %v299_v55 = vmax.f32 %v293_v52, 0.0  ;;  %935 = vmatpush.bf16.msrb.mxu0 %v2364_v51  ;;  %v2098_v51 = vld [vmem:[%s3482_s7 + $0xb8] sm:$0xf0] }
  0xad   :  { %v302_v56 = vpack.c.bf16 %v298_v54, %v298_v54  ;;  %948 = vmatpush.bf16.msrb.mxu1 %v2372_v1 }
  0xae   :  { %v303_v58 = vpack.c.bf16 %v299_v55, %v299_v55 }
  0xaf   :  { %728 = vmatmul.bf16.vlgmr.msrb.gmra.mxu2 %v302_v56 }
  0xb0   :  { %741 = vmatmul.bf16.vlgmr.msrb.gmra.mxu3 %v303_v58  ;;  %v281_v59 = vpop.f32.mrf.mxu2  ;;  %936 = vmatpush.bf16.msrb.mxu0 %v2363_v57 }
  0xb1   :  { %v294_v60 = vpop.f32.mrf.mxu3  ;;  %949 = vmatpush.bf16.msrb.mxu1 %v2371_v3  ;;  %1163 = vmatpush.bf16.msrb.mxu2 %v2121_v18  ;;  %v2080_v18 = vld [vmem:[%s3482_s7 + $0x88] sm:$0xf] }
  0xb2   :  { %1176 = vmatpush.bf16.msrb.mxu3 %v2125_v23  ;;  %v2081_v21 = vor.u32 %v2393_v19, %v2080_v18  ;;  %v2082_v23 = vld [vmem:[%s3482_s7 + $0x98] sm:$0xf0]  ;;  %v2435_v18 = vld [vmem:[%s3484_s9 + $0xe8] sm:$0xff] }
  0xb3   :  { %v2411_v19 = vld [vmem:[%s3484_s9 + $0x28] sm:$0xff] }
  0xb4   :  { %937 = vmatpush.bf16.msrb.mxu0 %v2362_v61 }
  0xb5   :  { %950 = vmatpush.bf16.msrb.mxu1 %v2370_v5  ;;  %1164 = vmatpush.bf16.msrb.mxu2 %v2105_v34  ;;  %v2065_v34 = vor.u32 %v2389_v32, %v2064_v31  ;;  %v2424_v31 = vld [vmem:[%s3484_s9 + $0x90] sm:$0xff] }
  0xb6   :  { %1177 = vmatpush.bf16.msrb.mxu3 %v2109_v35  ;;  %v2066_v35 = vld [vmem:[%s3482_s7 + $0x78] sm:$0xf0]  ;;  %v2432_v32 = vld [vmem:[%s3484_s9 + $0xd0] sm:$0xff] }
  0xb7   :  { %754 = vmatmul.bf16.vlgmr.msra.gmra.mxu0 %v300_v44  ;;  %v2394_v44 = vld [vmem:[%s3482_s7 + $0xa4] sm:$0xf] }
  0xb8   :  { %767 = vmatmul.bf16.vlgmr.msra.gmra.mxu1 %v301_v46  ;;  %938 = vmatpush.bf16.msrb.mxu0 %v2361_v63  ;;  %v2096_v46 = vld [vmem:[%s3482_s7 + $0xa8] sm:$0xf]  ;;  %v2093_v54 = vor.u32 %v2394_v44, %v2090_v45 }
  0xb9   :  { %951 = vmatpush.bf16.msrb.mxu1 %v2369_v6  ;;  %v2097_v55 = vor.u32 %v2397_v49, %v2096_v46  ;;  %1165 = vmatpush.bf16.msrb.mxu2 %v2089_v48  ;;  %v2383_v46 = vld [vmem:[%s3482_s7 + $0x4c] sm:$0xf]  ;;  %v2024_v48 = vld [vmem:[%s3482_s7 + $0x20] sm:$0xf] }
  0xba   :  { %1178 = vmatpush.bf16.msrb.mxu3 %v2093_v54 }
  0xbc   :  { %939 = vmatpush.bf16.msrb.mxu0 %v2360_v0 }
  0xbd   :  { %952 = vmatpush.bf16.msrb.mxu1 %v2368_v7 }
  0xbe   :  { %1179 = vmatpush.bf16.msrb.mxu3 %v2077_v20  ;;  %v2419_v20 = vld [vmem:[%s3484_s9 + $0x68] sm:$0xff] }
  0xbf   :  { %780 = vmatmul.bf16.vlgmr.msra.gmra.mxu2 %v302_v56  ;;  %v2101_v56 = vor.u32 %v2395_v50, %v2098_v51  ;;  %v2380_v50 = vld [vmem:[%s3482_s7 + $0x2c] sm:$0xf0]  ;;  %v2378_v51 = vld [vmem:[%s3482_s7 + $0x24] sm:$0xf] }
  0xc0   :  { %793 = vmatmul.bf16.vlgmr.msra.gmra.mxu3 %v303_v58  ;;  %940 = vmatpush.bf16.msrb.mxu0 %v2359_v2 }
  0xc1   :  { %953 = vmatpush.bf16.msrb.mxu1 %v2367_v8 }
  0xc4   :  { %941 = vmatpush.bf16.msrb.mxu0 %v2358_v4 }
  0xc5   :  { %954 = vmatpush.bf16.msrb.mxu1 %v2366_v13 }
  0xc8   :  { %1189 = vmatpush.bf16.msra.mxu0 %v2129_v24  ;;  %v2056_v24 = vld [vmem:[%s3482_s7 + $0x60] sm:$0xf] }
  0xc9   :  { %1202 = vmatpush.bf16.msra.mxu1 %v2133_v29  ;;  %v2057_v29 = vor.u32 %v2388_v26, %v2056_v24  ;;  %v2410_v24 = vld [vmem:[%s3484_s9 + $0x20] sm:$0xff]  ;;  %v2425_v26 = vld [vmem:[%s3484_s9 + $0x98] sm:$0xff] }
  0xcc   :  { %1190 = vmatpush.bf16.msra.mxu0 %v2113_v39  ;;  %v2382_v39 = vld [vmem:[%s3482_s7 + $0x44] sm:$0xf] }
  0xcd   :  { %1203 = vmatpush.bf16.msra.mxu1 %v2117_v43  ;;  %v2385_v43 = vld [vmem:[%s3482_s7 + $0x54] sm:$0xf0]  ;;  %v2045_v44 = vor.u32 %v2382_v39, %v2042_v41  ;;  %v2423_v39 = vld [vmem:[%s3484_s9 + $0x88] sm:$0xff]  ;;  %v2408_v41 = vld [vmem:[%s3484_s9 + $0x10] sm:$0xff] }
  0xce   :  { %v2049_v45 = vor.u32 %v2385_v43, %v2048_v42  ;;  %v2416_v42 = vld [vmem:[%s3484_s9 + $0x50] sm:$0xff]  ;;  %v2422_v43 = vld [vmem:[%s3484_s9 + $0x80] sm:$0xff] }
  0xd0   :  { %1191 = vmatpush.bf16.msra.mxu0 %v2097_v55  ;;  %v2032_v55 = vld [vmem:[%s3482_s7 + $0x28] sm:$0xf] }
  0xd1   :  { %1204 = vmatpush.bf16.msra.mxu1 %v2101_v56  ;;  %v2381_v56 = vld [vmem:[%s3482_s7 + $0x34] sm:$0xf0] }
  0xd4   :  { %1192 = vmatpush.bf16.msra.mxu0 %v2081_v21 }
  0xd8   :  { %1193 = vmatpush.bf16.msra.mxu0 %v2065_v34 }
  0xdc   :  { %1194 = vmatpush.bf16.msra.mxu0 %v2049_v45  ;;  %v2407_v45 = vld [vmem:[%s3484_s9 + $0x8] sm:$0xff] }
 0x124   :  { %v703_v10 = vpop.f32.mrf.mxu0 }
 0x125   :  { %v716_v11 = vpop.f32.mrf.mxu1  ;;  %v704_v14 = vadd.f32 %v703_v10, %v370_v12 }
 0x127   :  { %v717_v33 = vadd.f32 %v716_v11, %v704_v14  ;;  %v2392_v14 = vld [vmem:[%s3482_s7 + $0x8c] sm:$0xf0] }
 0x128   :  { %v2073_v16 = vor.u32 %v2392_v14, %v2072_v9  ;;  %v2428_v9 = vld [vmem:[%s3484_s9 + $0xb0] sm:$0xff] }
 0x129   :  { %v2436_v14 = vld [vmem:[%s3484_s9 + $0xf0] sm:$0xff] }
 0x12a   :  { %1166 = vmatpush.bf16.msrb.mxu2 %v2073_v16  ;;  %v2420_v16 = vld [vmem:[%s3484_s9 + $0x70] sm:$0xff] }
 0x12c   :  { %v705_v22 = vpop.f32.mrf.mxu0 }
 0x12d   :  { %v718_v28 = vpop.f32.mrf.mxu1  ;;  %v2391_v22 = vld [vmem:[%s3482_s7 + $0x8c] sm:$0xf] }
 0x12e   :  { %v2085_v25 = vor.u32 %v2391_v22, %v2082_v23  ;;  %v2058_v28 = vld [vmem:[%s3482_s7 + $0x70] sm:$0xf0]  ;;  %1167 = vmatpush.bf16.msrb.mxu2 %v2057_v29  ;;  %v2426_v22 = vld [vmem:[%s3484_s9 + $0xa0] sm:$0xff]  ;;  %v2417_v29 = vld [vmem:[%s3484_s9 + $0x58] sm:$0xff] }
 0x12f   :  { %v2061_v30 = vor.u32 %v2386_v27, %v2058_v28  ;;  %v2434_v23 = vld [vmem:[%s3484_s9 + $0xe0] sm:$0xff]  ;;  %v2433_v27 = vld [vmem:[%s3484_s9 + $0xd8] sm:$0xff] }
 0x130   :  { %1205 = vmatpush.bf16.msra.mxu1 %v2085_v25  ;;  %v2418_v25 = vld [vmem:[%s3484_s9 + $0x60] sm:$0xff]  ;;  %v2409_v28 = vld [vmem:[%s3484_s9 + $0x18] sm:$0xff] }
 0x131   :  { %1180 = vmatpush.bf16.msrb.mxu3 %v2061_v30 }
 0x132   :  { %v729_v47 = vpop.f32.mrf.mxu2  ;;  %1168 = vmatpush.bf16.msrb.mxu2 %v2041_v40  ;;  %v2431_v40 = vld [vmem:[%s3484_s9 + $0xc8] sm:$0xff] }
 0x133   :  { %v730_v52 = vadd.f32 %v729_v47, %v717_v33  ;;  %v742_v53 = vpop.f32.mrf.mxu3  ;;  %v2387_v33 = vld [vmem:[%s3482_s7 + $0x6c] sm:$0xf]  ;;  %v2050_v47 = vld [vmem:[%s3482_s7 + $0x58] sm:$0xf0] }
 0x134   :  { %v755_v58 = vpop.f32.mrf.mxu0  ;;  %v2069_v36 = vor.u32 %v2387_v33, %v2066_v35  ;;  %v2053_v49 = vor.u32 %v2383_v46, %v2050_v47  ;;  %v2439_v33 = vld [vmem:[%s3481_s6] ss:$0 sm:$0xff]  ;;  %v2415_v46 = vld [vmem:[%s3484_s9 + $0x48] sm:$0xff] }
 0x135   :  { %v743_v57 = vadd.f32 %v742_v53, %v730_v52  ;;  %v768_v59 = vpop.f32.mrf.mxu1  ;;  %v756_v1 = vadd.f32 %v755_v58, %v371_v62  ;;  %v2026_v52 = vld [vmem:[%s3482_s7 + $0x30] sm:$0xf0]  ;;  %1181 = vmatpush.bf16.msrb.mxu3 %v2045_v44  ;;  %v2025_v53 = vor.u32 %v2380_v50, %v2024_v48  ;;  %v2033_v58 = vor.u32 %v2381_v56, %v2032_v55  ;;  %v2376_v62 = vld [vmem:[%s3482_s7 + $0xc] sm:$0xf0]  ;;  %v2430_v44 = vld [vmem:[%s3484_s9 + $0xc0] sm:$0xff] }
 0x136   :  { %1206 = vmatpush.bf16.msra.mxu1 %v2069_v36  ;;  %v2029_v54 = vor.u32 %v2378_v51, %v2026_v52  ;;  %v2406_v47 = vld [vmem:[%s3484_s9] sm:$0xff] }
 0x137   :  { %v798_v60 = vmax.f32 %v743_v57, 0.0  ;;  %v769_v4 = vadd.f32 %v768_v59, %v756_v1  ;;  %v2379_v57 = vld [vmem:[%s3482_s7 + $0x2c] sm:$0xf]  ;;  %v2034_v59 = vld [vmem:[%s3482_s7 + $0x38] sm:$0xf0]  ;;  %1169 = vmatpush.bf16.msrb.mxu2 %v2025_v53  ;;  %1195 = vmatpush.bf16.msra.mxu0 %v2033_v58  ;;  %v2414_v48 = vld [vmem:[%s3484_s9 + $0x40] sm:$0xff] }
 0x138   :  { %v2010_v1 = vld [vmem:[%s3482_s7 + $0x10] sm:$0xf0] }
 0x139   :  { %v800_v61 = vpack.c.bf16 %v798_v60, %v798_v60  ;;  %v2037_v60 = vor.u32 %v2379_v57, %v2034_v59  ;;  %1182 = vmatpush.bf16.msrb.mxu3 %v2029_v54 }
 0x13a   :  { %v731_v63 = vpop.f32.mrf.mxu2  ;;  %1207 = vmatpush.bf16.msra.mxu1 %v2053_v49  ;;  %v993_v49 = vld [vmem:[%s3483_s8] sm:$0xf] }
 0x13b   :  { %v744_v0 = vpop.f32.mrf.mxu3  ;;  %942 = vmatmul.bf16.vlgmr.msrb.gmra.mxu0 %v800_v61  ;;  %v2008_v61 = vld [vmem:[%s3482_s7] sm:$0xf]  ;;  %v2374_v63 = vld [vmem:[%s3482_s7 + $0x4] sm:$0xf]  ;;  %v997_v50 = vperm.slane %v993_v49, 2  ;;  %v998_v51 = vperm.slane %v993_v49, 3 }
 0x13c   :  { %v757_v2 = vpop.f32.mrf.mxu0  ;;  %v2009_v0 = vor.u32 %v2376_v62, %v2008_v61  ;;  %v995_v56 = vperm.slane %v993_v49, 0  ;;  %v996_v57 = vperm.slane %v993_v49, 1 }
 0x13d   :  { %v770_v3 = vpop.f32.mrf.mxu1  ;;  %v2016_v2 = vld [vmem:[%s3482_s7 + $0x8] sm:$0xf] }
 0x13e   :  { %1208 = vmatpush.bf16.msra.mxu1 %v2037_v60  ;;  %v2377_v3 = vld [vmem:[%s3482_s7 + $0x14] sm:$0xf0]  ;;  %1170 = vmatpush.bf16.msrb.mxu2 %v2009_v0 }
 0x142   :  { %v781_v5 = vpop.f32.mrf.mxu2 }
 0x143   :  { %v782_v6 = vadd.f32 %v781_v5, %v769_v4  ;;  %v794_v7 = vpop.f32.mrf.mxu3  ;;  %v2013_v4 = vor.u32 %v2374_v63, %v2010_v1  ;;  %v2017_v5 = vor.u32 %v2377_v3, %v2016_v2 }
 0x145   :  { %v795_v8 = vadd.f32 %v794_v7, %v782_v6  ;;  %v2375_v6 = vld [vmem:[%s3482_s7 + $0xc] sm:$0xf]  ;;  %v2018_v7 = vld [vmem:[%s3482_s7 + $0x18] sm:$0xf0]  ;;  %1183 = vmatpush.bf16.msrb.mxu3 %v2013_v4  ;;  %1196 = vmatpush.bf16.msra.mxu0 %v2017_v5 }
 0x147   :  { %v799_v10 = vmax.f32 %v795_v8, 0.0  ;;  %v2021_v8 = vor.u32 %v2375_v6, %v2018_v7 }
 0x149   :  { %v801_v11 = vpack.c.bf16 %v799_v10, %v799_v10  ;;  %1209 = vmatpush.bf16.msra.mxu1 %v2021_v8  ;;  %v2429_v10 = vld [vmem:[%s3484_s9 + $0xb8] sm:$0xff] }
 0x14a   :  { %v783_v12 = vpop.f32.mrf.mxu2  ;;  %1509 = vmatpush.bf16.msrb.mxu0 %v2429_v10 }
 0x14b   :  { %v796_v13 = vpop.f32.mrf.mxu3  ;;  %955 = vmatmul.bf16.vlgmr.msrb.gmra.mxu1 %v801_v11  ;;  %v2437_v11 = vld [vmem:[%s3484_s9 + $0xf8] sm:$0xff] }
 0x14c   :  { %v2413_v12 = vld [vmem:[%s3484_s9 + $0x38] sm:$0xff] }
 0x14d   :  { %v2421_v13 = vld [vmem:[%s3484_s9 + $0x78] sm:$0xff]  ;;  %1522 = vmatpush.bf16.msrb.mxu1 %v2437_v11  ;;  %1483 = vmatpush.bf16.msra.mxu2 %v2413_v12 }
 0x14e   :  { %1496 = vmatpush.bf16.msra.mxu3 %v2421_v13  ;;  %1510 = vmatpush.bf16.msrb.mxu0 %v2428_v9 }
 0x151   :  { %1523 = vmatpush.bf16.msrb.mxu1 %v2436_v14  ;;  %1484 = vmatpush.bf16.msra.mxu2 %v2412_v15  ;;  %v2440_v14 = vld [vmem:[%s3485_s10] ss:$0 sm:$0xff] }
 0x152   :  { %1497 = vmatpush.bf16.msra.mxu3 %v2420_v16  ;;  %1511 = vmatpush.bf16.msrb.mxu0 %v2427_v17 }
 0x155   :  { %1524 = vmatpush.bf16.msrb.mxu1 %v2435_v18  ;;  %1485 = vmatpush.bf16.msra.mxu2 %v2411_v19 }
 0x156   :  { %1498 = vmatpush.bf16.msra.mxu3 %v2419_v20  ;;  %1512 = vmatpush.bf16.msrb.mxu0 %v2426_v22 }
 0x159   :  { %1525 = vmatpush.bf16.msrb.mxu1 %v2434_v23  ;;  %1486 = vmatpush.bf16.msra.mxu2 %v2410_v24 }
 0x15a   :  { %1499 = vmatpush.bf16.msra.mxu3 %v2418_v25  ;;  %1513 = vmatpush.bf16.msrb.mxu0 %v2425_v26 }
 0x15d   :  { %1526 = vmatpush.bf16.msrb.mxu1 %v2433_v27  ;;  %1487 = vmatpush.bf16.msra.mxu2 %v2409_v28 }
 0x15e   :  { %1500 = vmatpush.bf16.msra.mxu3 %v2417_v29  ;;  %1514 = vmatpush.bf16.msrb.mxu0 %v2424_v31 }
 0x161   :  { %1527 = vmatpush.bf16.msrb.mxu1 %v2432_v32  ;;  %1488 = vmatpush.bf16.msra.mxu2 %v2408_v41 }
 0x162   :  { %1515 = vmatpush.bf16.msrb.mxu0 %v2423_v39  ;;  %1501 = vmatpush.bf16.msra.mxu3 %v2416_v42 }
 0x165   :  { %1528 = vmatpush.bf16.msrb.mxu1 %v2431_v40  ;;  %1489 = vmatpush.bf16.msra.mxu2 %v2407_v45 }
 0x166   :  { %1516 = vmatpush.bf16.msrb.mxu0 %v2422_v43  ;;  %1502 = vmatpush.bf16.msra.mxu3 %v2415_v46 }
 0x169   :  { %1529 = vmatpush.bf16.msrb.mxu1 %v2430_v44  ;;  %1490 = vmatpush.bf16.msra.mxu2 %v2406_v47 }
 0x16a   :  { %1503 = vmatpush.bf16.msra.mxu3 %v2414_v48 }
 0x1b8   :  { %v943_v21 = vpop.f32.mrf.mxu0 }
 0x1b9   :  { %v944_v34 = vadd.f32 %v2439_v33, %v943_v21 }
 0x1c0   :  { %v945_v30 = vpop.f32.mrf.mxu0 }
 0x1c8   :  { %v956_v35 = vpop.f32.mrf.mxu1 }
 0x1c9   :  { %v957_v36 = vadd.f32 %v956_v35, %v944_v34 }
 0x1cb   :  { %v960_v37 = vpack.c.bf16 %v957_v36, %v957_v36  ;;  %1537 = vst [vmem:[%s3487_s12] sm:$0xff] %v957_v36 }
 0x1cd   :  { %1171 = vmatmul.bf16.vlgmr.msrb.gmra.mxu2 %v960_v37  ;;  %1184 = vmatmul.bf16.vlgmr.msrb.gmra.mxu3 %v960_v37 }
 0x1ce   :  { %1197 = vmatmul.bf16.vlgmr.msra.gmra.mxu0 %v960_v37  ;;  %1210 = vmatmul.bf16.vlgmr.msra.gmra.mxu1 %v960_v37 }
 0x1d0   :  { %v958_v38 = vpop.f32.mrf.mxu1 }
 0x24b   :  { %v1198_v52 = vpop.f32.mrf.mxu0  ;;  %v1211_v53 = vpop.f32.mrf.mxu1 }
 0x24c   :  { %v1199_v54 = vadd.f32 %v1198_v52, %v997_v50  ;;  %v1212_v55 = vadd.f32 %v1211_v53, %v998_v51 }
 0x24e   :  { %v1217_v58 = vmax.f32 %v1199_v54, 0.0  ;;  %v1218_v59 = vmax.f32 %v1212_v55, 0.0 }
 0x250   :  { %v1221_v60 = vpack.c.bf16 %v1217_v58, %v1217_v58  ;;  %v1222_v61 = vpack.c.bf16 %v1218_v59, %v1218_v59  ;;  %v1172_v62 = vpop.f32.mrf.mxu2  ;;  %v1185_v63 = vpop.f32.mrf.mxu3 }
 0x251   :  { %v1173_v0 = vadd.f32 %v1172_v62, %v995_v56  ;;  %v1186_v1 = vadd.f32 %v1185_v63, %v996_v57 }
 0x252   :  { %1517 = vmatmul.bf16.vlgmr.msrb.gmra.mxu0 %v1221_v60  ;;  %1530 = vmatmul.bf16.vlgmr.msrb.gmra.mxu1 %v1222_v61 }
 0x253   :  { %v1215_v2 = vmax.f32 %v1173_v0, 0.0  ;;  %v1216_v3 = vmax.f32 %v1186_v1, 0.0  ;;  %v1200_v4 = vpop.f32.mrf.mxu0  ;;  %v1213_v5 = vpop.f32.mrf.mxu1 }
 0x255   :  { %v1219_v6 = vpack.c.bf16 %v1215_v2, %v1215_v2  ;;  %v1220_v7 = vpack.c.bf16 %v1216_v3, %v1216_v3 }
 0x257   :  { %1491 = vmatmul.bf16.vlgmr.msra.gmra.mxu2 %v1219_v6  ;;  %1504 = vmatmul.bf16.vlgmr.msra.gmra.mxu3 %v1220_v7 }
 0x258   :  { %v1174_v8 = vpop.f32.mrf.mxu2  ;;  %v1187_v10 = vpop.f32.mrf.mxu3 }
 0x2cf   :  { %v1518_v11 = vpop.f32.mrf.mxu0  ;;  %v1531_v12 = vpop.f32.mrf.mxu1 }
 0x2d7   :  { %v1520_v13 = vpop.f32.mrf.mxu0  ;;  %v1533_v9 = vpop.f32.mrf.mxu1 }
 0x2da   :  { %v1492_v15 = vpop.f32.mrf.mxu2  ;;  %v1505_v16 = vpop.f32.mrf.mxu3 }
 0x2db   :  { %v1493_v17 = vadd.f32 %v2440_v14, %v1492_v15 }
 0x2dd   :  { %v1506_v18 = vadd.f32 %v1505_v16, %v1493_v17 }
 0x2df   :  { %v1519_v19 = vadd.f32 %v1518_v11, %v1506_v18 }
 0x2e1   :  { %v1532_v20 = vadd.f32 %v1531_v12, %v1519_v19 }
 0x2e2   :  { %v1494_v21 = vpop.f32.mrf.mxu2  ;;  %v1507_v22 = vpop.f32.mrf.mxu3 }
 0x2e3   :  { %2441 = vtanh.f32 %v1532_v20 }
 0x2e9   :  { %v2442_v23 = vpop.eup %2441 }
 0x2ea   :  { %1536 = vst [vmem:[#allocation2] sm:$0xff] %v2442_v23 }
 0x2eb   :  { %1548 = dma.vmem_to_hbm [thread:$0]  %s1544_s16, 128, %s1546_s18, [#allocation3]  }
 0x2ec   :  { %2467 = dma.done.wait [#allocation3], 128  }
 0x2ed   :  { %2468 = vsyncadd [#allocation3], 4294967168 }
 0x2ee   :  { %1557 = vsyncpa [#allocation3], 1 }

</bundles_post_ra>
